<compile_context>
chip_gen: v6e
topology: v6e:2x2x1
jax: 0.10.0
libtpu: 0.0.40
codegen_flags: <defaults>
</compile_context>

<pallas_src>
import functools

import jax
import jax.numpy as jnp
from jax import lax
from jax.experimental import pallas as pl
from jax.experimental.pallas import tpu as pltpu


def _channel_attention_kernel(x_ref, w1_ref, w2_ref, o_ref, *, inv_hw):
    """One grid step == one batch element.

    x_ref : (1, C, HW)  input with spatial flattened into the (lane-dense) minor dim
    w1_ref: (C, R)      squeeze 1x1-conv weights, laid out (in_ch, out_ch)
    w2_ref: (C, R)      excite 1x1-conv weights, laid out (out_ch, in_ch) as stored
    o_ref : (1, C, 1)   per-channel attention weights (sigmoid output)
    """
    x = x_ref[0].astype(jnp.float32)                        # (C, HW)

    # ---- global average pool: lane reduction over HW ----
    pooled = jnp.sum(x, axis=-1, keepdims=True) * inv_hw    # (C, 1)

    w1 = w1_ref[...].astype(jnp.float32)                    # (C, R)
    w2 = w2_ref[...].astype(jnp.float32)                    # (C, R)

    # ---- squeeze 1x1 conv (no bias): h[r] = sum_c pooled[c] * w1[c, r] ----
    # VPU broadcast-multiply + small cross-sublane reduce (no MXU).
    h = jnp.sum(w1 * pooled, axis=0, keepdims=True)         # (1, R)
    # SiLU: h * sigmoid(h)   (exp on the EUP)
    h = h * (1.0 / (1.0 + jnp.exp(-h)))

    # ---- excite 1x1 conv (no bias): a[c] = sum_r h[r] * w2[c, r] ----
    a = jnp.sum(w2 * h, axis=1, keepdims=True)              # (C, 1)
    # Sigmoid
    a = 1.0 / (1.0 + jnp.exp(-a))

    o_ref[0] = a.astype(o_ref.dtype)


def rtg_channel_attention(x_nchw, w1, w2):
    """x: (N, C, H, W); w1: (R, C, 1, 1) [conv C->R]; w2: (C, R, 1, 1) [conv R->C]."""
    N, C, H, W = x_nchw.shape
    R = w1.shape[0]
    HW = H * W

    # Free contiguous reshape: spatial becomes the minor dim -> lane-dense reduce.
    x_flat = x_nchw.reshape(N, C, HW)
    w1_k = jnp.transpose(w1[:, :, 0, 0], (1, 0))            # (C, R)
    w2_k = w2[:, :, 0, 0]                                   # (C, R)

    kernel = functools.partial(_channel_attention_kernel, inv_hw=1.0 / HW)

    out = pl.pallas_call(
        kernel,
        out_shape=jax.ShapeDtypeStruct((N, C, 1), x_nchw.dtype),
        grid_spec=pltpu.PrefetchScalarGridSpec(
            num_scalar_prefetch=0,
            grid=(N,),                                      # parallel axis: both TCs on v7x
            in_specs=[
                pl.BlockSpec((1, C, HW), lambda n: (n, 0, 0)),
                pl.BlockSpec((C, R), lambda n: (0, 0)),
                pl.BlockSpec((C, R), lambda n: (0, 0)),
            ],
            out_specs=pl.BlockSpec((1, C, 1), lambda n: (n, 0, 0)),
        ),
        compiler_params=pltpu.CompilerParams(
            dimension_semantics=("parallel",)),
    )(x_flat, w1_k, w2_k)

    return out.reshape(N, C, 1, 1)


def _reference(x, w1, w2):
    pooled = jnp.mean(x, axis=(2, 3), keepdims=True)        # AdaptiveAvgPool2d(1)
    h = lax.conv_general_dilated(pooled, w1, (1, 1), "VALID",
                                 dimension_numbers=("NCHW", "OIHW", "NCHW"))
    h = h * jax.nn.sigmoid(h)                               # SiLU
    a = lax.conv_general_dilated(h, w2, (1, 1), "VALID",
                                 dimension_numbers=("NCHW", "OIHW", "NCHW"))
    return jax.nn.sigmoid(a)


if __name__ == "__main__":
    # Module hyper-parameters (synthetic, deterministic).
    in_channel, reduce_to = 4, 2
    N, H, W = 2, 16, 16

    key = jax.random.PRNGKey(0)
    k_x, k_w1, k_w2 = jax.random.split(key, 3)

    x = jax.random.normal(k_x, (N, in_channel, H, W), jnp.float32)
    # Conv2d(in_channel -> reduce_to, 1x1, no bias) and Conv2d(reduce_to -> in_channel, 1x1, no bias).
    w1 = jax.random.normal(k_w1, (reduce_to, in_channel, 1, 1), jnp.float32) * 0.5
    w2 = jax.random.normal(k_w2, (in_channel, reduce_to, 1, 1), jnp.float32) * 0.5

    out = rtg_channel_attention(x, w1, w2)
    out = jax.block_until_ready(out)

    ref = _reference(x, w1, w2)
    assert out.shape == ref.shape == (N, in_channel, 1, 1), (out.shape, ref.shape)
    assert jnp.allclose(out, ref, atol=1e-5, rtol=1e-5), \
        float(jnp.max(jnp.abs(out - ref)))

    print("KERNEL_OK")
</pallas_src>

<mosaic_0001>
module attributes {stable_mosaic.version = 11 : i64} {
  func.func @_channel_attention_kernel(%arg0: i32, %arg1: memref<1x4x256xf32, #tpu.memory_space<vmem>>, %arg2: memref<4x2xf32, #tpu.memory_space<vmem>>, %arg3: memref<4x2xf32, #tpu.memory_space<vmem>>, %arg4: memref<1x4x1xf32, #tpu.memory_space<vmem>>) attributes {dimension_semantics = [#tpu.dimension_semantics<parallel>], iteration_bounds = array<i64: 2>, scalar_prefetch = 0 : i64, scratch_operands = 0 : i64, tpu.core_type = #tpu.core_type<tc>, window_params = [{transform_indices = @transform_0, window_bounds = array<i64: 1, 4, 256>}, {pipeline_mode = #tpu.pipeline_mode<synchronous>, transform_indices = @transform_1, window_bounds = array<i64: 4, 2>}, {pipeline_mode = #tpu.pipeline_mode<synchronous>, transform_indices = @transform_2, window_bounds = array<i64: 4, 2>}, {transform_indices = @transform_3, window_bounds = array<i64: 1, 4, 1>}]} {
    %c0 = arith.constant 0 : index
    %c0_0 = arith.constant 0 : index
    %c0_1 = arith.constant 0 : index
    %0 = vector.load %arg1[%c0, %c0_0, %c0_1] : memref<1x4x256xf32, #tpu.memory_space<vmem>>, vector<1x4x256xf32>
    %1 = vector.shape_cast %0 : vector<1x4x256xf32> to vector<4x256xf32>
    %cst = arith.constant dense<0.000000e+00> : vector<4xf32>
    %2 = vector.multi_reduction <add>, %1, %cst [1] : vector<4x256xf32> to vector<4xf32>
    %3 = vector.shape_cast %2 : vector<4xf32> to vector<4x1xf32>
    %cst_2 = arith.constant 3.906250e-03 : f32
    %4 = vector.broadcast %cst_2 : f32 to vector<4x1xf32>
    %5 = arith.mulf %3, %4 : vector<4x1xf32>
    %c0_3 = arith.constant 0 : index
    %c0_4 = arith.constant 0 : index
    %6 = vector.load %arg2[%c0_3, %c0_4] : memref<4x2xf32, #tpu.memory_space<vmem>>, vector<4x2xf32>
    %c0_5 = arith.constant 0 : index
    %c0_6 = arith.constant 0 : index
    %7 = vector.load %arg3[%c0_5, %c0_6] : memref<4x2xf32, #tpu.memory_space<vmem>>, vector<4x2xf32>
    %8 = vector.broadcast %5 : vector<4x1xf32> to vector<4x2xf32>
    %9 = arith.mulf %6, %8 : vector<4x2xf32>
    %cst_7 = arith.constant dense<0.000000e+00> : vector<2xf32>
    %10 = vector.multi_reduction <add>, %9, %cst_7 [0] : vector<4x2xf32> to vector<2xf32>
    %11 = vector.shape_cast %10 : vector<2xf32> to vector<1x2xf32>
    %cst_8 = arith.constant 0.000000e+00 : f32
    %12 = vector.broadcast %cst_8 : f32 to vector<1x2xf32>
    %13 = arith.subf %12, %11 : vector<1x2xf32>
    %14 = math.exp %13 : vector<1x2xf32>
    %cst_9 = arith.constant 1.000000e+00 : f32
    %15 = vector.broadcast %cst_9 : f32 to vector<1x2xf32>
    %16 = arith.addf %15, %14 : vector<1x2xf32>
    %cst_10 = arith.constant 1.000000e+00 : f32
    %17 = vector.broadcast %cst_10 : f32 to vector<1x2xf32>
    %18 = arith.divf %17, %16 : vector<1x2xf32>
    %19 = arith.mulf %11, %18 : vector<1x2xf32>
    %20 = vector.broadcast %19 : vector<1x2xf32> to vector<4x2xf32>
    %21 = arith.mulf %7, %20 : vector<4x2xf32>
    %cst_11 = arith.constant dense<0.000000e+00> : vector<4xf32>
    %22 = vector.multi_reduction <add>, %21, %cst_11 [1] : vector<4x2xf32> to vector<4xf32>
    %23 = vector.shape_cast %22 : vector<4xf32> to vector<4x1xf32>
    %cst_12 = arith.constant 0.000000e+00 : f32
    %24 = vector.broadcast %cst_12 : f32 to vector<4x1xf32>
    %25 = arith.subf %24, %23 : vector<4x1xf32>
    %26 = math.exp %25 : vector<4x1xf32>
    %cst_13 = arith.constant 1.000000e+00 : f32
    %27 = vector.broadcast %cst_13 : f32 to vector<4x1xf32>
    %28 = arith.addf %27, %26 : vector<4x1xf32>
    %cst_14 = arith.constant 1.000000e+00 : f32
    %29 = vector.broadcast %cst_14 : f32 to vector<4x1xf32>
    %30 = arith.divf %29, %28 : vector<4x1xf32>
    %c0_15 = arith.constant 0 : index
    %c0_16 = arith.constant 0 : index
    %c0_17 = arith.constant 0 : index
    %31 = vector.load %arg4[%c0_15, %c0_16, %c0_17] : memref<1x4x1xf32, #tpu.memory_space<vmem>>, vector<1x4x1xf32>
    %32 = vector.shape_cast %31 : vector<1x4x1xf32> to vector<4x1xf32>
    %33 = vector.shape_cast %30 : vector<4x1xf32> to vector<1x4x1xf32>
    tpu.vector_store %arg4[%c0_15, %c0_16, %c0_17], %33 {strides = array<i32>} : memref<1x4x1xf32, #tpu.memory_space<vmem>>, vector<1x4x1xf32>,
    return
  }
  func.func @transform_0(%arg0: i32) -> (i32, i32, i32) {
    %c0_i32 = arith.constant 0 : i32
    %c0_i32_0 = arith.constant 0 : i32
    %c0_i32_1 = arith.constant 0 : i32
    return %arg0, %c0_i32, %c0_i32_0 : i32, i32, i32
  }
  func.func @transform_1(%arg0: i32) -> (i32, i32) {
    %c0_i32 = arith.constant 0 : i32
    %c0_i32_0 = arith.constant 0 : i32
    %c0_i32_1 = arith.constant 0 : i32
    return %c0_i32, %c0_i32_0 : i32, i32
  }
  func.func @transform_2(%arg0: i32) -> (i32, i32) {
    %c0_i32 = arith.constant 0 : i32
    %c0_i32_0 = arith.constant 0 : i32
    %c0_i32_1 = arith.constant 0 : i32
    return %c0_i32, %c0_i32_0 : i32, i32
  }
  func.func @transform_3(%arg0: i32) -> (i32, i32, i32) {
    %c0_i32 = arith.constant 0 : i32
    %c0_i32_0 = arith.constant 0 : i32
    %c0_i32_1 = arith.constant 0 : i32
    return %arg0, %c0_i32, %c0_i32_0 : i32, i32, i32
  }
}

</mosaic_0001>

<bundles_post_ra>
// kernel: tpu_custom_call.1
= control target key start
LH: loop header
LB: loop body
LE: loop exit
PB: predicated region body
PF: predicated region fallthrough
CT: control target
= control target key end

     0   :  { %8 = vsyncpa [#allocation3], 0  ;;  %s546_s0 = inlined_call_operand.hbm [shape: f32[2,4,256], index: 0, kind: input, shape index: {}]   ;;  %s547_s1 = inlined_call_operand.vmem [shape: f32[4,2], index: 1, kind: input, shape index: {}]   ;;  %s548_s2 = inlined_call_operand.vmem [shape: f32[4,2], index: 2, kind: input, shape index: {}]   ;;  %s549_s3 = inlined_call_operand.vmem [shape: f32[2,4,1], index: 3, kind: output, shape index: {}]  }
   0x1   :  { %10 = vsyncpa [#allocation3 + $0x1], 0  ;;  %s438_s12 = smov 0   ;;  %s440_s13 = smov 0  }
   0x2   :  { %s442_s14 = smov 0   ;;  %s444_s15 = smov 0  }
   0x3 LB: > { %s457_s16 = sadd.s32 4294967295, %s415_s15   ;;  %s460_s17 = sadd.s32 1, %s415_s15   ;;  %s415_s15 = sphi %s444_s15, %s559_s15   ;;  %s411_s14 = sphi %s442_s14, %s558_s14   ;;  %s407_s13 = sphi %s440_s13, %s557_s13   ;;  %s403_s12 = sphi %s438_s12, %s556_s12  }
   0x4   : > { %s20_s18 = ssub.s32 %s415_s15, %s460_s17  ;;  %s23_s19 = sadd.s32 1, %s411_s14 }
   0x5   : > { %p21_p0 = scmp.eq.s32.totalorder %s20_s18, 0  ;;  %p30_p1 = scmp.ne.s32.totalorder %s411_s14, %s407_s13 }
   0x6   : > { %p31_p2 = scmp.eq.s32.totalorder %s415_s15, 0  ;;  %p36_p3 = scmp.ne.s32.totalorder %s407_s13, %s403_s12 }
   0x7   : > { %s470_s20 = scalar_select %p21_p0, %s411_s14, %s23_s19  }
   0x8   : > { %p32_p4 = por %p31_p2, %p30_p1  ;;  %p37_p5 = scmp.eq.s32.totalorder %s457_s16, 0 }
   0x9   : > { %p311_p6 = scmp.lt.s32.totalorder %s415_s15, 2  ;;  %s134_s22 = sand.u32 1, %s411_s14  }
   0xa   : > { %p474_p7 = por %p37_p5, %p36_p3  ;;  %s296_s23 = sshll.u32 %s134_s22, 3 }
   0xb   : > { %s304_s24 = sshll.u32 %s415_s15, 7  ;;  %s138_s28 = scalar_lea.vmem [#allocation2], %s296_s23 }
   0xc   : > { %s551_s21 = scalar_select %p474_p7, 1, 0 }
   0xd   : > { %s483_s27 = scalar_lea.hbm %s546_s0, %s304_s24  ;;  %s146_s29 = sshll.u32 %s138_s28, 4  ;;  %s485_s29 = int_to_ptr.vmem [resolvable:$true] %s146_s29 }
   0xe   : > { %p487_p8 = pnand %p311_p6, %p32_p4  ;;  %s135_s4 = scalar_lea.sflag [#allocation3], %s134_s22 }
   0xf   : > { %s353_s5 = scalar_lea.hbm %s483_s27, 128  ;;  %s358_s8 = scalar_lea.hbm %s546_s0, 256 }
  0x10   : > { %p354_p11 = scmp.ne.s32.totalorder %s483_s27, %s353_s5  ;;  %p355_p12 = pneg %p487_p8 }
  0x11   : > { %p359_p1 = scmp.lt.s32.totalorder %s483_s27, %s546_s0  ;;  %p360_p2 = scmp.lt.s32.totalorder %s358_s8, %s353_s5 }
  0x12   : > { %p356_p13 = pnand %p355_p12, %p354_p11 }
  0x13   : > { %p361_p3 = por %p360_p2, %p359_p1 }
  0x14   : > { %p357_p0 = pneg %p356_p13 }
  0x16   : > { %p362_p4 = pnand %p361_p3, %p357_p0 }
  0x18   : > { %365 = shalt.err (!%p362_p4)
}
  0x19   : > { %s366_s11 = scalar_lea.vmem %s485_s29, 128  ;;  %s417_s12 = smov [#allocation2]  }
  0x1a   : > { %p367_p5 = scmp.ne.s32.totalorder %s485_s29, %s366_s11  ;;  %s371_s18 = sshll.u32 %s417_s12, 4  ;;  %s372_s18 = int_to_ptr.vmem [resolvable:$false] %s371_s18 }
  0x1b   : > { %s373_s19 = scalar_lea.vmem %s372_s18, 256  ;;  %p374_p13 = scmp.lt.s32.totalorder %s485_s29, %s372_s18 }
  0x1c   : > { %p369_p6 = pnand %p367_p5, %p355_p12  ;;  %p375_p9 = scmp.lt.s32.totalorder %s373_s19, %s366_s11 }
  0x1e   : > { %p370_p11 = pneg %p369_p6  ;;  %p376_p10 = por %p375_p9, %p374_p13 }
  0x20   : > { %p377_p7 = pnand %p376_p10, %p370_p11 }
  0x22   : > { %380 = shalt.err (!%p377_p7)
}
  0x23   : > { %310 = dma.hbm_to_vmem [thread:$0]  (!%p487_p8), %s483_s27, 128, %s485_s29, %s135_s4  }
  0x24   : > { %p553_p0 = scmp.lt.s32.totalorder %s415_s15, 3  ;;  %p554_p1 = scmp.ge.s32.totalorder %s415_s15, 1 }
  0x26   : > { %p152_p12 = pnand %p554_p1, %p553_p0 }
  0x27   : > { %s157_s22 = sand.u32 (!%p152_p12), 1, %s407_s13   ;;  %p555_p9 = scmp.ne.s32.totalorder (!%p152_p12), %s551_s21, 0 }
  0x28   : > { %155 = sbr.rel (%p152_p12) target bundleno = 419 (0x1a3), region = 32  ;;  %s300_s23 = sshll.u32 (!%p152_p12), %s157_s22, 3 }
  0x29   : > { %s158_s24 = scalar_lea.sflag (!%p152_p12), [#allocation3], %s157_s22  ;;  %s161_s25 = scalar_lea.vmem (!%p152_p12), [#allocation2], %s300_s23 }
  0x2d   : > { %398 = dma.done.wait (%p555_p9), %s158_s24, 128  }
  0x2e   : > { %400 = vsyncadd (%p555_p9), %s158_s24, 4294967168  ;;  %vm191_vm0 = vcmask 1043456   ;;  %v187_v0 = vld [vmem:[%s161_s25] sm:$0xff]  ;;  %vm201_vm1 = vcmask 11264   ;;  %p183_p7 = scmp.lt.s32.totalorder %s457_s16, 1  ;;  %vm226_vm2 = vcmask 3072  }
  0x2f   : > { %v189_v1 = vcombine.high %v187_v0, %v187_v0  ;;  %v192_v2 = vsel %vm191_vm0, %v187_v0, 0.0  ;;  %v198_v5 = vld [vmem:[%s547_s1] sm:$0xf] }
  0x30   : > { %v199_v21 = vld [vmem:[%s548_s2] sm:$0xf]  ;;  %s561_s16 = smov (!%p183_p7, %s457_s16), 1 }
  0x31   : > { %v193_v3 = vsel %vm191_vm0, %v189_v1, 0.0  ;;  %s301_s28 = sshll.u32 %s561_s16, 2 }
  0x32   : > { %v194_v4 = vadd.f32 %v193_v3, %v192_v2  ;;  %s186_s4 = scalar_lea.vmem %s549_s3, %s301_s28 }
  0x34   : > { %195 = vadd.xlane.f32.xlu0 %v194_v4 }
  0xbd   : > { %v196_v6 = vpop.xlane.xlu0 %195 }
  0xbe   : > { %v197_v7 = vmul.f32 0.00390625, %v196_v6 }
  0xc0   : > { %v200_v8 = vmul.f32 %v198_v5, %v197_v7 }
  0xc2   : > { %v202_v9 = vsel %vm201_vm1, %v200_v8, 0.0 }
  0xc3   : > { %v203_v10 = vrot.slane %v202_v9, 4 }
  0xc5   : > { %v204_v11 = vadd.f32 %v203_v10, %v202_v9 }
  0xc7   : > { %v205_v12 = vrot.slane %v204_v11, 2 }
  0xc9   : > { %v206_v13 = vadd.f32 %v205_v12, %v204_v11 }
  0xcb   : > { %v207_v14 = vrot.slane %v206_v13, 1 }
  0xcd   : > { %v208_v15 = vadd.f32 %v207_v14, %v206_v13 }
  0xcf   : > { %v209_v16 = vsub.f32 0.0, %v208_v15 }
  0xd1   : > { %v210_v17 = vmul.f32 1.442695, %v209_v16 }
  0xd3   : > { %345 = vpow2.f32 %v210_v17 }
  0xe0   : > { %v346_v18 = vpop.eup %345 }
  0xe1   : > { %v212_v19 = vadd.f32 1.0, %v346_v18 }
  0xe3   : > { %347 = vrcp.f32 %v212_v19 }
  0xf0   : > { %v348_v20 = vpop.eup %347 }
  0xf1   : > { %v215_v22 = vmul.f32 %v348_v20, %v208_v15 }
  0xf3   : > { %v216_v23 = vmul.f32 %v215_v22, %v199_v21 }
  0xf5   : > { %v217_v24 = vsel %vm201_vm1, %v216_v23, 0.0 }
  0xf6   : > { %218 = vadd.xlane.f32.xlu0 %v217_v24 }
 0x17f   : > { %v219_v25 = vpop.xlane.xlu0 %218 }
 0x180   : > { %v220_v26 = vsub.f32 0.0, %v219_v25 }
 0x182   : > { %v221_v27 = vmul.f32 1.442695, %v220_v26 }
 0x184   : > { %349 = vpow2.f32 %v221_v27 }
 0x191   : > { %v350_v28 = vpop.eup %349 }
 0x192   : > { %v223_v29 = vadd.f32 1.0, %v350_v28 }
 0x194   : > { %351 = vrcp.f32 %v223_v29 }
 0x1a1   : > { %v352_v30 = vpop.eup %351 }
 0x1a2   : > { %227 = vst.msk [vmem:[%s186_s4] sm:$0xf] %vm226_vm2, %v352_v30 }
 0x1a3 PF: > { %p13_p8 = scmp.ge.s32.totalorder %s460_s17, 4   ;;  %s556_s12 = smov %s407_s13 }
 0x1a4   : > { %s557_s13 = smov %s411_s14  ;;  %s558_s14 = smov %s470_s20 }
 0x1a5   : > { %s559_s15 = smov %s460_s17  ;;  %15 = sbr.rel (!%p13_p8) target bundleno = 3 (0x3), region = 72 }
 0x1aa   :  { %247 = vsyncpa [#allocation3], 1 }
 0x1ab   :  { %249 = vsyncpa [#allocation3 + $0x1], 1 }

</bundles_post_ra>
